<compile_context>
chip_gen: v5e
topology: v5e:2x2
jax: 0.10.0
libtpu: 0.0.40
codegen_flags: <defaults>
</compile_context>

<pallas_src>
import math

import jax
import jax.numpy as jnp
import numpy as np
from jax.experimental import pallas as pl
from jax.experimental.pallas import tpu as pltpu


def _gauss_kernel_mxu(d_ref, e_ref, p_ref, o_ref):
    # d_ref: (TR, 3K) bf16-exact split distances (hi, mid, lo per packed col)
    # e_ref: (3K, W)  0/1 expansion matrix, W = K*size; E[3g+j, g*size+s] = 1
    # p_ref: (8, W)   row 0: mean, row 1: A = -0.5/std^2, row 2: log_coef
    # o_ref: (TR, W)  lane-dense output tile (W is a multiple of 128)
    d_b = jnp.dot(d_ref[...], e_ref[...], preferred_element_type=jnp.float32)
    t = d_b - p_ref[0:1, :]
    o_ref[...] = jnp.exp(t * t * p_ref[1:2, :] + p_ref[2:3, :]).astype(o_ref.dtype)


def _gauss_kernel_vpu(d_ref, p_ref, o_ref):
    # k == 1 path (size multiple of 128): plain VPU broadcast, no MXU.
    t = d_ref[...] - p_ref[0:1, :]
    o_ref[...] = jnp.exp(t * t * p_ref[1:2, :] + p_ref[2:3, :]).astype(o_ref.dtype)


def gaussian_dist_embedding(d, means, stds, *, tile_rows=8192,
                            out_dtype=jnp.float32):
    """Pallas implementation of GaussianDistEmbedding.forward.

    d:      any-shape float array of distances
    means:  (size,) float32
    stds:   (size,) float32
    returns (d.size, size) array of dtype `out_dtype` (float32 by default)
    """
    size = int(means.shape[0])
    d_flat = jnp.asarray(d, jnp.float32).reshape(-1)
    n = int(d_flat.shape[0])
    if n == 0:
        return jnp.zeros((0, size), out_dtype)

    # Lane packing: fold k distance rows into one output row of width
    # w = k*size, with w a multiple of 128 (unmasked, lane-dense stores).
    k = 128 // math.gcd(size, 128)
    w = k * size

    rem = n % k
    n_pad = n + (k - rem if rem else 0)
    if n_pad != n:
        d_flat = jnp.pad(d_flat, (0, n_pad - n))
    rows = n_pad // k

    # Per-parameter precompute (O(size)); exponent fully folded:
    #   out = exp((d - mean)^2 * A + log_coef)
    #   A = -0.5 / std^2,  log_coef = -log(2*sqrt(pi)*std)
    means_f = jnp.asarray(means, jnp.float32)
    inv_std = 1.0 / jnp.asarray(stds, jnp.float32)
    a_coef = -0.5 * inv_std * inv_std
    log_coef = jnp.log(inv_std / (2.0 * np.pi ** 0.5))
    params = jnp.zeros((8, w), jnp.float32)
    params = params.at[0].set(jnp.tile(means_f, k))
    params = params.at[1].set(jnp.tile(a_coef, k))
    params = params.at[2].set(jnp.tile(log_coef, k))

    # Tile sizing: ~4 MiB output blocks, all dims multiples of 8 sublanes,
    # and >= 2 grid steps when there is enough work (v7x has 2 TensorCores).
    tile_rows = max(8, (int(tile_rows) // 8) * 8)
    budget_rows = max(8, ((4 * 1024 * 1024) // (w * 4) // 8) * 8)
    tr = min(tile_rows, budget_rows)
    if rows > 8:
        half = (((rows + 1) // 2) + 7) // 8 * 8
        tr = min(tr, half)
    tr = max(8, tr)
    grid = (pl.cdiv(rows, tr),)

    common = dict(
        out_shape=jax.ShapeDtypeStruct((rows, w), out_dtype),
        compiler_params=pltpu.CompilerParams(
            dimension_semantics=("parallel",),      # shards grid across TCs on v7x
            vmem_limit_bytes=32 * 1024 * 1024,      # safe on v5e/v6e/v7x
        ),
    )

    if k > 1:
        # Split d into three bf16-exact components so the MXU broadcast is
        # exact whether the MXU runs f32 natively or in bf16 passes.
        d_hi = d_flat.astype(jnp.bfloat16).astype(jnp.float32)
        r1 = d_flat - d_hi
        d_mid = r1.astype(jnp.bfloat16).astype(jnp.float32)
        d_lo = r1 - d_mid
        d_split = jnp.stack([d_hi, d_mid, d_lo], axis=-1).reshape(rows, 3 * k)
        # E[3g+j, g*size+s] = 1  ->  (d_split @ E)[r, g*size+s] = d[r*k+g]
        expand = jnp.repeat(
            jnp.repeat(jnp.eye(k, dtype=jnp.float32), 3, axis=0), size, axis=1)

        out_packed = pl.pallas_call(
            _gauss_kernel_mxu,
            grid_spec=pltpu.PrefetchScalarGridSpec(
                num_scalar_prefetch=0,
                grid=grid,
                in_specs=[
                    pl.BlockSpec((tr, 3 * k), lambda i: (i, 0)),
                    # Constant index_map -> parameter blocks stay VMEM-resident.
                    pl.BlockSpec((3 * k, w), lambda i: (0, 0)),
                    pl.BlockSpec((8, w), lambda i: (0, 0)),
                ],
                out_specs=pl.BlockSpec((tr, w), lambda i: (i, 0)),
            ),
            **common,
        )(d_split, expand, params)
    else:
        d_col = d_flat.reshape(rows, 1)
        out_packed = pl.pallas_call(
            _gauss_kernel_vpu,
            grid_spec=pltpu.PrefetchScalarGridSpec(
                num_scalar_prefetch=0,
                grid=grid,
                in_specs=[
                    pl.BlockSpec((tr, 1), lambda i: (i, 0)),
                    pl.BlockSpec((8, w), lambda i: (0, 0)),
                ],
                out_specs=pl.BlockSpec((tr, w), lambda i: (i, 0)),
            ),
            **common,
        )(d_col, params)

    # Free reshape: (rows, k*size) -> (rows*k, size) is contiguous.
    out = out_packed.reshape(rows * k, size)
    if n_pad != n:
        out = out[:n]      # only when N % k != 0
    return out


def make_params(size, max_dist):
    """Deterministic parameter init matching GaussianDistEmbedding.__init__."""
    means = jnp.linspace(0.0, max_dist, size, dtype=jnp.float32)
    stds = jnp.ones((size,), dtype=jnp.float32)
    return means, stds


def _reference(d, means, stds):
    d = d.reshape(-1, 1).astype(jnp.float32)
    z = (d - means[None, :]) / stds[None, :]
    return jnp.exp(-0.5 * z * z) / (2.0 * (np.pi ** 0.5) * stds[None, :])


if __name__ == "__main__":
    size = 32
    max_dist = 5.0
    means, stds = make_params(size, max_dist)

    key = jax.random.PRNGKey(0)
    # small distance input, e.g. pairwise distances for 2 x 64 edges
    d = jax.random.uniform(key, (2, 64), dtype=jnp.float32) * max_dist

    out = gaussian_dist_embedding(d, means, stds)
    out = jax.block_until_ready(out)

    ref = _reference(d, means, stds)
    assert out.shape == (d.size, size), out.shape
    assert jnp.allclose(out, ref, atol=1e-5, rtol=1e-5), float(
        jnp.max(jnp.abs(out - ref))
    )

    print("KERNEL_OK")
</pallas_src>

<mosaic_0001>
module attributes {stable_mosaic.version = 11 : i64} {
  func.func @_gauss_kernel_mxu(%arg0: i32, %arg1: memref<16x12xf32, #tpu.memory_space<vmem>>, %arg2: memref<12x128xf32, #tpu.memory_space<vmem>>, %arg3: memref<8x128xf32, #tpu.memory_space<vmem>>, %arg4: memref<16x128xf32, #tpu.memory_space<vmem>>) attributes {dimension_semantics = [#tpu.dimension_semantics<parallel>], iteration_bounds = array<i64: 2>, scalar_prefetch = 0 : i64, scratch_operands = 0 : i64, tpu.core_type = #tpu.core_type<tc>, window_params = [{transform_indices = @transform_0, window_bounds = array<i64: 16, 12>}, {pipeline_mode = #tpu.pipeline_mode<synchronous>, transform_indices = @transform_1, window_bounds = array<i64: 12, 128>}, {pipeline_mode = #tpu.pipeline_mode<synchronous>, transform_indices = @transform_2, window_bounds = array<i64: 8, 128>}, {transform_indices = @transform_3, window_bounds = array<i64: 16, 128>}]} {
    %c0 = arith.constant 0 : index
    %c0_0 = arith.constant 0 : index
    %0 = vector.load %arg1[%c0, %c0_0] : memref<16x12xf32, #tpu.memory_space<vmem>>, vector<16x12xf32>
    %c0_1 = arith.constant 0 : index
    %c0_2 = arith.constant 0 : index
    %1 = vector.load %arg2[%c0_1, %c0_2] : memref<12x128xf32, #tpu.memory_space<vmem>>, vector<12x128xf32>
    %cst = arith.constant dense<0.000000e+00> : vector<16x128xf32>
    %2 = tpu.matmul %0, %1, %cst {dimension_numbers = #tpu.dot_dimension_numbers<[1], [0], [0], [1], [0, 0, 1, 1], [], []>} : vector<16x12xf32>, vector<12x128xf32>, vector<16x128xf32> -> vector<16x128xf32>
    %c0_3 = arith.constant 0 : index
    %c0_4 = arith.constant 0 : index
    %3 = vector.load %arg3[%c0_3, %c0_4] : memref<8x128xf32, #tpu.memory_space<vmem>>, vector<1x128xf32>
    %4 = vector.broadcast %3 : vector<1x128xf32> to vector<16x128xf32>
    %5 = arith.subf %2, %4 : vector<16x128xf32>
    %6 = arith.mulf %5, %5 : vector<16x128xf32>
    %c1 = arith.constant 1 : index
    %c0_5 = arith.constant 0 : index
    %7 = vector.load %arg3[%c1, %c0_5] : memref<8x128xf32, #tpu.memory_space<vmem>>, vector<1x128xf32>
    %8 = vector.broadcast %7 : vector<1x128xf32> to vector<16x128xf32>
    %9 = arith.mulf %6, %8 : vector<16x128xf32>
    %c2 = arith.constant 2 : index
    %c0_6 = arith.constant 0 : index
    %10 = vector.load %arg3[%c2, %c0_6] : memref<8x128xf32, #tpu.memory_space<vmem>>, vector<1x128xf32>
    %11 = vector.broadcast %10 : vector<1x128xf32> to vector<16x128xf32>
    %12 = arith.addf %9, %11 : vector<16x128xf32>
    %13 = math.exp %12 : vector<16x128xf32>
    %c0_7 = arith.constant 0 : index
    %c0_8 = arith.constant 0 : index
    %14 = vector.load %arg4[%c0_7, %c0_8] : memref<16x128xf32, #tpu.memory_space<vmem>>, vector<16x128xf32>
    tpu.vector_store %arg4[%c0_7, %c0_8], %13 {strides = array<i32>} : memref<16x128xf32, #tpu.memory_space<vmem>>, vector<16x128xf32>,
    return
  }
  func.func @transform_0(%arg0: i32) -> (i32, i32) {
    %c0_i32 = arith.constant 0 : i32
    %c0_i32_0 = arith.constant 0 : i32
    return %arg0, %c0_i32 : i32, i32
  }
  func.func @transform_1(%arg0: i32) -> (i32, i32) {
    %c0_i32 = arith.constant 0 : i32
    %c0_i32_0 = arith.constant 0 : i32
    %c0_i32_1 = arith.constant 0 : i32
    return %c0_i32, %c0_i32_0 : i32, i32
  }
  func.func @transform_2(%arg0: i32) -> (i32, i32) {
    %c0_i32 = arith.constant 0 : i32
    %c0_i32_0 = arith.constant 0 : i32
    %c0_i32_1 = arith.constant 0 : i32
    return %c0_i32, %c0_i32_0 : i32, i32
  }
  func.func @transform_3(%arg0: i32) -> (i32, i32) {
    %c0_i32 = arith.constant 0 : i32
    %c0_i32_0 = arith.constant 0 : i32
    return %arg0, %c0_i32 : i32, i32
  }
}

</mosaic_0001>

<bundles_post_ra>
// kernel: tpu_custom_call.1
= control target key start
LH: loop header
LB: loop body
LE: loop exit
PB: predicated region body
PF: predicated region fallthrough
CT: control target
= control target key end

     0   :  { %8 = vsyncpa [#allocation3], 0  ;;  %s559_s0 = inlined_call_operand.vmem [shape: f32[32,12], index: 0, kind: input, shape index: {}]   ;;  %s560_s1 = inlined_call_operand.vmem [shape: f32[12,128], index: 1, kind: input, shape index: {}]   ;;  %s561_s2 = inlined_call_operand.vmem [shape: f32[8,128], index: 2, kind: input, shape index: {}]   ;;  %s562_s3 = inlined_call_operand.hbm [shape: f32[32,128], index: 3, kind: output, shape index: {}]  }
   0x1   :  { %10 = vsyncpa [#allocation3 + $0x1], 0  ;;  %s460_s12 = smov 0   ;;  %s462_s13 = smov 0  }
   0x2   :  { %s464_s14 = smov 0   ;;  %s466_s15 = smov 0  }
   0x3 LB: > { %s481_s16 = sadd.s32 4294967295, %s436_s15   ;;  %s308_s17 = sadd.s32 4294967294, %s436_s15   ;;  %s436_s15 = sphi %s466_s15, %s568_s15   ;;  %s432_s14 = sphi %s464_s14, %s567_s14   ;;  %s428_s13 = sphi %s462_s13, %s566_s13   ;;  %s424_s12 = sphi %s460_s12, %s565_s12  }
   0x4   : > { %s485_s18 = sadd.s32 1, %s436_s15   ;;  %s91_s19 = sadd.s32 1, %s432_s14 }
   0x5   : > { %s88_s20 = ssub.s32 %s436_s15, %s485_s18  ;;  %p101_p0 = scmp.ne.s32.totalorder %s432_s14, %s428_s13 }
   0x6   : > { %p89_p1 = scmp.eq.s32.totalorder %s88_s20, 0  ;;  %p102_p2 = scmp.eq.s32.totalorder %s481_s16, 1 }
   0x7   : > { %p107_p3 = scmp.ne.s32.totalorder %s428_s13, %s424_s12  ;;  %p108_p4 = scmp.eq.s32.totalorder %s308_s17, 1 }
   0x8   : > { %s496_s21 = scalar_select %p89_p1, %s432_s14, %s91_s19  }
   0x9   : > { %p498_p5 = por %p102_p2, %p101_p0  ;;  %p502_p6 = por %p108_p4, %p107_p3 }
   0xa   : > { %p311_p7 = scmp.ge.s32.totalorder %s436_s15, 1  ;;  %p141_p8 = scmp.lt.s32.totalorder %s436_s15, 3 }
   0xc   : > { %p142_p9 = pnand %p311_p7, %p141_p8 }
   0xd   : > { %s313_s28 = sshll.u32 (!%p142_p9), %s481_s16, 1  ;;  %s162_s17 = sand.u32 (!%p142_p9), 1, %s428_s13  }
   0xe   : > { %145 = sbr.rel (%p142_p9) target bundleno = 171 (0xab), region = 32  ;;  %p166_p10 = scmp.lt.s32.totalorder (!%p142_p9), %s313_s28, 3 }
   0xf   : > { %s312_s19 = sshll.u32 (!%p142_p9), %s162_s17, 4  ;;  %s323_s20 = sshll.u32 (!%p142_p9), %s481_s16, 4 }
  0x10   : > { %s242_s26 = scalar_lea.hbm (!%p142_p9), %s562_s3, %s323_s20  ;;  %s164_s27 = scalar_lea.vmem (!%p142_p9), [#allocation2], %s312_s19 }
  0x11   : > { %s231_s30 = scalar_lea.sflag (!%p142_p9), [#allocation3], %s162_s17  ;;  %s394_s7 = scalar_lea.hbm (!%p142_p9), %s562_s3, 32 }
  0x13   : > { %v175_v0 = vld [vmem:[%s560_s1 + $0x8] sm:$0xf]  ;;  %vm183_vm0 = vcmask 1043456   ;;  %v174_v1 = vld [vmem:[%s560_s1] sm:$0xff]  ;;  %s570_s28 = smov (!%p166_p10, %s313_s28), 3  ;;  %vm176_vm1 = vcmask 97280  }
  0x14   : > { %315 = vmatpush.msk.msra.mxu0 %vm183_vm0, %v175_v0  ;;  %324 = vmatpush.msk.msra.mxu1 %vm183_vm0, %v175_v0  ;;  %s314_s29 = sshll.u32 %s570_s28, 3  ;;  %v367_v4 = vld [vmem:[%s561_s2] ss:$0 sm:$0xff]  ;;  %v368_v8 = vld [vmem:[%s561_s2 + $0x1] ss:$0 sm:$0xff]  ;;  %s243_s28 = sshll.u32 %s164_s27, 4  ;;  %s244_s28 = int_to_ptr.vmem [resolvable:$true] %s243_s28 }
  0x15   : > { %s169_s5 = scalar_lea.vmem %s559_s0, %s314_s29  ;;  %v369_v11 = vld [vmem:[%s561_s2 + $0x2] ss:$0 sm:$0xff]  ;;  %s245_s29 = sshll.u32 %s242_s26, 4  ;;  %s246_s29 = int_to_ptr.hbm [resolvable:$true] %s245_s29 }
  0x16   : > { %202 = vmatpush.msra.mxu0 %v174_v1  ;;  %325 = vmatpush.msra.mxu1 %v174_v1  ;;  %v172_v2 = vld [vmem:[%s169_s5] sm:$0xff]  ;;  %v173_v3 = vld [vmem:[%s169_s5 + $0x8] sm:$0xff]  ;;  %s388_s16 = sshra.s32 %s246_s29, 4  ;;  %s389_s16 = int_to_ptr.hbm [resolvable:$true] %s388_s16 }
  0x17   : > { %316 = vmatmul.msk.f32.vlgmr.msra.gmra.mxu0 %vm176_vm1, %v172_v2  ;;  %317 = vmatmul.msk.f32.vlgmr.msra.gmra.mxu1 %vm176_vm1, %v173_v3  ;;  %s390_s4 = scalar_lea.hbm %s389_s16, 16  ;;  %p395_p0 = scmp.lt.s32.totalorder %s389_s16, %s562_s3 }
  0x18   : > { %p391_p11 = scmp.ne.s32.totalorder %s389_s16, %s390_s4  ;;  %p396_p1 = scmp.lt.s32.totalorder %s394_s7, %s390_s4 }
  0x1a   : > { %p392_p12 = pnand %p391_p11, %p498_p5  ;;  %p397_p2 = por %p396_p1, %p395_p0 }
  0x1c   : > { %p393_p13 = pneg %p392_p12 }
  0x1e   : > { %p398_p3 = pnand %p397_p2, %p393_p13 }
  0x94   : > { %v204_v5 = vpop.f32.mrf.mxu0  ;;  %v207_v6 = vpop.f32.mrf.mxu1 }
  0x95   : > { %v212_v7 = vsub.f32 %v204_v5, %v367_v4  ;;  %v213_v9 = vsub.f32 %v207_v6, %v367_v4 }
  0x97   : > { %v214_v10 = vmul.f32 %v212_v7, %v212_v7  ;;  %v215_v12 = vmul.f32 %v213_v9, %v213_v9 }
  0x99   : > { %v218_v13 = vmul.f32 %v368_v8, %v214_v10  ;;  %v219_v14 = vmul.f32 %v368_v8, %v215_v12 }
  0x9b   : > { %v222_v15 = vadd.f32 %v369_v11, %v218_v13  ;;  %v223_v16 = vadd.f32 %v369_v11, %v219_v14 }
  0x9d   : > { %v224_v17 = vmul.f32 1.442695, %v222_v15  ;;  %v226_v18 = vmul.f32 1.442695, %v223_v16 }
  0x9f   : > { %370 = vpow2.f32 %v224_v17 }
  0xa0   : > { %372 = vpow2.f32 %v226_v18 }
  0xa5   : > { %v371_v19 = vpop.eup %370 }
  0xa6   : > { %v373_v20 = vpop.eup %372  ;;  %228 = vst [vmem:[%s164_s27] sm:$0xff] %v371_v19 }
  0xa7   : > { %229 = vst [vmem:[%s164_s27 + $0x8] sm:$0xff] %v373_v20 }
  0xa8   : > { %401 = shalt.err (!%p398_p3)
}
  0xa9   : > { %s438_s10 = smov 128   ;;  %s439_s11 = smov 8  }
  0xaa   : > { %326 = dma.vmem_to_hbm [thread:$0]  (%p498_p5), %s244_s28, 256, %s246_s29, %s231_s30, %s438_s10, %s438_s10, %s439_s11  }
  0xab PF: > { %p332_p4 = scmp.ge.s32.totalorder %s436_s15, 2  ;;  %s260_s17 = sand.u32 1, %s424_s12  }
  0xac   : > { %s261_s19 = scalar_lea.sflag [#allocation3], %s260_s17 }
  0xad   : > { %p329_p7 = pnand %p332_p4, %p502_p6 }
  0xaf   : > { %p330_p8 = pneg %p329_p7 }
  0xb1   : > { %419 = dma.done.wait (%p330_p8), %s261_s19, 256  }
  0xb2   : > { %421 = vsyncadd (%p330_p8), %s261_s19, 4294967040  ;;  %p13_p9 = scmp.ge.s32.totalorder %s485_s18, 4   ;;  %s565_s12 = smov %s428_s13 }
  0xb3   : > { %s566_s13 = smov %s432_s14  ;;  %s567_s14 = smov %s496_s21 }
  0xb4   : > { %s568_s15 = smov %s485_s18  ;;  %15 = sbr.rel (!%p13_p9) target bundleno = 3 (0x3), region = 67 }
  0xb9   :  { %267 = vsyncpa [#allocation3], 1 }
  0xba   :  { %269 = vsyncpa [#allocation3 + $0x1], 1 }

</bundles_post_ra>
